<compile_context>
chip_gen: v7x
topology: tpu7x:2x2x1
jax: 0.10.0
libtpu: 0.0.40
codegen_flags: <defaults>
</compile_context>

<pallas_src>
import functools

import jax
import jax.numpy as jnp
from jax import lax
from jax.experimental import pallas as pl
from jax.experimental.pallas import tpu as pltpu

EPS = 1e-5  # PyTorch BatchNorm2d default eps


# ------------------------------- Pallas kernel -------------------------------


def _fused_unit_kernel(*refs, wo, fused_shortcut):
    """Whole ShakeShakeResUnit (eval) for one image of the batch.

    refs (fused_shortcut=True):  taps1, w12, b12, wcat, b2, colmask, z, ws, bs, out
    refs (fused_shortcut=False): taps1, w12, b12, wcat, b2, colmask, ident, out

    taps1:(1,9*Cin,HW) w12:(2C,9*Cin) b12:(2C,1) wcat:(C,18C) b2:(C,1) colmask:(2,HW)
    z:(1,2*Cin,HW) ws:(C,2*Cin) bs:(C,1) ident:(1,C,HW) out:(1,C,HW);  C=out_c, HW=Ho*Wo.
    """
    if fused_shortcut:
        (taps1_ref, w12_ref, b12_ref, wcat_ref, b2_ref, cmask_ref,
         z_ref, ws_ref, bs_ref, out_ref) = refs
    else:
        (taps1_ref, w12_ref, b12_ref, wcat_ref, b2_ref, cmask_ref,
         ident_ref, out_ref) = refs

    # ---- stage 1: both branches' conv3x3(stride) + folded-BN + ReLU, ONE matmul ----
    y12 = jnp.dot(w12_ref[...], taps1_ref[0], preferred_element_type=jnp.float32)
    y12 = jnp.maximum(y12 + b12_ref[...], 0.0)                 # (2C, HW) f32

    # ---- build stage-2 3x3 taps in VMEM (no HBM round trip / 9x re-read) ----
    # Shifts along the flattened Ho*Wo axis of a zero-padded slab; the vertical
    # (dy) out-of-range taps land in the zero padding, the horizontal (dx=+-1)
    # row-boundary wrap-around is killed by the precomputed column masks.
    hw = y12.shape[1]
    pad_w = wo + 1
    zpad = jnp.zeros((y12.shape[0], pad_w), jnp.float32)
    y12p = jnp.concatenate([zpad, y12, zpad], axis=1)          # (2C, HW + 2*(wo+1))
    cm = cmask_ref[...]
    not_left = cm[0:1, :]                                      # 0 where ox == 0
    not_right = cm[1:2, :]                                     # 0 where ox == wo-1
    taps = []
    for dy in (-1, 0, 1):
        for dx in (-1, 0, 1):
            s = pad_w + dy * wo + dx
            t = y12p[:, s:s + hw]
            if dx == -1:
                t = t * not_left
            elif dx == 1:
                t = t * not_right
            taps.append(t)
    t2 = jnp.concatenate(taps, axis=0).astype(wcat_ref.dtype)  # (18C, HW)

    # ---- stage 2: both branches' conv3x3 + BN + the 0.5*(y1+y2) shake combine,
    #      all folded into ONE matmul (+ combined bias). ----
    y = jnp.dot(wcat_ref[...], t2, preferred_element_type=jnp.float32) + b2_ref[...]

    # ---- identity / ShakeShakeShortcut (block-diagonal 1x1 convs + folded BN) ----
    if fused_shortcut:
        ident = jnp.dot(ws_ref[...], z_ref[0], preferred_element_type=jnp.float32)
        ident = ident + bs_ref[...]
    else:
        ident = ident_ref[0].astype(jnp.float32)               # residual stays f32

    out_ref[0] = jnp.maximum(y + ident, 0.0).astype(out_ref.dtype)


# ------------------------------ JAX glue / wrapper ----------------------------


def _im2col_nchw(x, ksize, stride, pad):
    """x: (B, C, H, W) -> (B, ksize*ksize*C, Ho*Wo); K row order (ky, kx, c)."""
    b, c, h, w = x.shape
    xp = jnp.pad(x, ((0, 0), (0, 0), (pad, pad), (pad, pad)))
    ho = (h + 2 * pad - ksize) // stride + 1
    wo = (w + 2 * pad - ksize) // stride + 1
    taps = []
    for ky in range(ksize):
        for kx in range(ksize):
            t = xp[:, :,
                   ky: ky + (ho - 1) * stride + 1: stride,
                   kx: kx + (wo - 1) * stride + 1: stride]
            taps.append(t.reshape(b, c, ho * wo))
    return jnp.concatenate(taps, axis=1)


def _flat_w(w_hwio):
    """(kh, kw, cin, cout) -> (cout, kh*kw*cin); K row order matches _im2col_nchw."""
    kh, kw, cin, cout = w_hwio.shape
    return w_hwio.reshape(kh * kw * cin, cout).T


def _fuse_bn(bn):
    scale = bn["gamma"] / jnp.sqrt(bn["var"] + EPS)
    bias = bn["beta"] - bn["mean"] * scale
    return scale, bias


@functools.partial(jax.jit, static_argnames=("stride", "matmul_dtype"))
def shake_shake_res_unit(x_nchw, params, stride, matmul_dtype=jnp.float32):
    """Eval-mode ShakeShakeResUnit forward. Input/output are NCHW (PyTorch layout)."""
    x = x_nchw.astype(jnp.float32)
    b, cin, h, w = x.shape
    out_c = params["branch1"]["conv1_w"].shape[-1]
    resize = (cin != out_c) or (stride != 1)
    md = matmul_dtype

    ho = (h + 2 - 3) // stride + 1
    wo = (w + 2 - 3) // stride + 1
    hw = ho * wo

    # Stage-1 im2col slab, per image: (B, 9*Cin, HW).
    taps1 = _im2col_nchw(x, 3, stride, 1)

    # Stage-1 weights with BN scale folded in (f32 fold, then cast).
    s1a, b1a = _fuse_bn(params["branch1"]["bn1"])
    s2a, b2a = _fuse_bn(params["branch2"]["bn1"])
    w12 = jnp.concatenate(
        [_flat_w(params["branch1"]["conv1_w"]) * s1a[:, None],
         _flat_w(params["branch2"]["conv1_w"]) * s2a[:, None]], axis=0)   # (2C, 9*Cin)
    b12 = jnp.concatenate([b1a, b2a])[:, None]                            # (2C, 1)

    # Stage-2: fold BN scale AND the 0.5 eval-mode shake factor into ONE weight.
    s1b, b1b = _fuse_bn(params["branch1"]["bn2"])
    s2b, b2b = _fuse_bn(params["branch2"]["bn2"])
    w1f = (_flat_w(params["branch1"]["conv2_w"]) * (0.5 * s1b)[:, None]
           ).reshape(out_c, 9, out_c)
    w2f = (_flat_w(params["branch2"]["conv2_w"]) * (0.5 * s2b)[:, None]
           ).reshape(out_c, 9, out_c)
    wcat = jnp.concatenate([w1f, w2f], axis=2).reshape(out_c, 18 * out_c)  # (C, 18C)
    b2 = (0.5 * (b1b + b2b))[:, None]                                      # (C, 1)

    # Column masks for the in-kernel tap shifts (dx = -1 / +1 at row boundaries).
    ox = jnp.arange(hw, dtype=jnp.int32) % wo
    colmask = jnp.stack([(ox != 0), (ox != wo - 1)]).astype(jnp.float32)   # (2, HW)

    args = [taps1.astype(md), w12.astype(md), b12, wcat.astype(md), b2, colmask]

    def bcast(a):
        return pl.BlockSpec(a.shape, lambda i: (0,) * a.ndim)

    def per_img(a):
        return pl.BlockSpec((1,) + a.shape[1:], lambda i: (i, 0, 0))

    in_specs = [per_img(taps1), bcast(w12), bcast(b12), bcast(wcat), bcast(b2),
                bcast(colmask)]

    if resize:
        sc = params["shortcut"]
        mid = out_c // 2
        # Path 1: AvgPool2d(k=1, stride) == strided subsample, then conv1x1.
        # Path 2: drop LAST row/col, ZeroPad2d((1,0,1,0)) == pad top/left, subsample,
        #         conv1x1 — exactly as in the PyTorch spec.
        xs1 = x[:, :, ::stride, ::stride].reshape(b, cin, hw)
        xs2 = jnp.pad(x[:, :, : h - 1, : w - 1],
                      ((0, 0), (0, 0), (1, 0), (1, 0)))[:, :, ::stride, ::stride]
        z = jnp.concatenate([xs1, xs2.reshape(b, cin, hw)], axis=1)        # (B,2Cin,HW)
        ss, bs = _fuse_bn(sc["bn"])
        # Block-diagonal weight does both 1x1 convs + channel concat in one dot;
        # BN scale folded into the rows.
        ws = jnp.zeros((out_c, 2 * cin), jnp.float32)
        ws = ws.at[:mid, :cin].set(sc["conv1_w"].reshape(cin, mid).T)
        ws = ws.at[mid:, cin:].set(sc["conv2_w"].reshape(cin, mid).T)
        ws = ws * ss[:, None]
        bs2 = bs[:, None]
        args += [z.astype(md), ws.astype(md), bs2]
        in_specs += [per_img(z), bcast(ws), bcast(bs2)]
    else:
        ident = x.reshape(b, cin, hw)            # residual kept f32 (cheapest stream)
        args += [ident]
        in_specs += [per_img(ident)]

    out = pl.pallas_call(
        functools.partial(_fused_unit_kernel, wo=wo, fused_shortcut=resize),
        out_shape=jax.ShapeDtypeStruct((b, out_c, hw), jnp.float32),
        grid=(b,),
        in_specs=in_specs,
        out_specs=pl.BlockSpec((1, out_c, hw), lambda i: (i, 0, 0)),
        compiler_params=pltpu.CompilerParams(dimension_semantics=("parallel",)),
    )(*args)

    return out.reshape(b, out_c, ho, wo)         # already NCHW; reshape is free


# ------------------------ deterministic parameter init ----------------------


def _init_bn(key, c):
    k1, k2, k3, k4 = jax.random.split(key, 4)
    return dict(
        gamma=1.0 + 0.1 * jax.random.normal(k1, (c,), jnp.float32),
        beta=0.1 * jax.random.normal(k2, (c,), jnp.float32),
        mean=0.1 * jax.random.normal(k3, (c,), jnp.float32),
        var=1.0 + 0.1 * jax.random.uniform(k4, (c,), jnp.float32),
    )


def _init_branch(key, cin, cout):
    k1, k2, k3, k4 = jax.random.split(key, 4)
    return dict(
        conv1_w=0.1 * jax.random.normal(k1, (3, 3, cin, cout), jnp.float32),
        bn1=_init_bn(k2, cout),
        conv2_w=0.1 * jax.random.normal(k3, (3, 3, cout, cout), jnp.float32),
        bn2=_init_bn(k4, cout),
    )


def init_params(key, in_c, out_c):
    keys = jax.random.split(key, 5)
    mid = out_c // 2
    return dict(
        branch1=_init_branch(keys[0], in_c, out_c),
        branch2=_init_branch(keys[1], in_c, out_c),
        shortcut=dict(
            conv1_w=0.1 * jax.random.normal(keys[2], (1, 1, in_c, mid), jnp.float32),
            conv2_w=0.1 * jax.random.normal(keys[3], (1, 1, in_c, mid), jnp.float32),
            bn=_init_bn(keys[4], out_c),
        ),
    )


# ----------------------------- pure-JAX reference ---------------------------


def _conv_ref(x, w, stride, pad):
    return lax.conv_general_dilated(
        x, w, window_strides=(stride, stride),
        padding=[(pad, pad), (pad, pad)],
        dimension_numbers=("NHWC", "HWIO", "NHWC"),
        precision=lax.Precision.HIGHEST,
    )


def _bn_ref(x, bn):
    s = bn["gamma"] / jnp.sqrt(bn["var"] + EPS)
    b = bn["beta"] - bn["mean"] * s
    return x * s + b


def ref_forward(x_nchw, params, stride):
    x = jnp.transpose(x_nchw, (0, 2, 3, 1)).astype(jnp.float32)

    def branch(xx, p):
        y = jnp.maximum(_bn_ref(_conv_ref(xx, p["conv1_w"], stride, 1), p["bn1"]), 0.0)
        return _bn_ref(_conv_ref(y, p["conv2_w"], 1, 1), p["bn2"])

    def shortcut(xx, p):
        b, h, w, c = xx.shape
        y1 = _conv_ref(xx[:, ::stride, ::stride, :], p["conv1_w"], 1, 0)
        x2 = jnp.pad(xx[:, : h - 1, : w - 1, :], ((0, 0), (1, 0), (1, 0), (0, 0)))
        y2 = _conv_ref(x2[:, ::stride, ::stride, :], p["conv2_w"], 1, 0)
        return _bn_ref(jnp.concatenate([y1, y2], axis=-1), p["bn"])

    x1 = branch(x, params["branch1"])
    x2 = branch(x, params["branch2"])
    in_c, out_c = x.shape[-1], x1.shape[-1]
    ident = shortcut(x, params["shortcut"]) if (in_c != out_c or stride != 1) else x
    y = jnp.maximum(0.5 * (x1 + x2) + ident, 0.0)
    return jnp.transpose(y, (0, 3, 1, 2))


# ---------------------------------- main ------------------------------------


if __name__ == "__main__":
    key = jax.random.PRNGKey(0)

    # bf16 MXU operands on real TPU (native rate); f32 on the interpret/CPU path,
    # whose dot does not support BF16 x BF16 = F32.
    matmul_dtype = jnp.bfloat16 if jax.default_backend() == "tpu" else jnp.float32
    tol = 3e-2 if matmul_dtype == jnp.bfloat16 else 1e-3

    configs = [
        # (B, in_c, out_c, H, W, stride)
        (2, 4, 8, 16, 16, 1),   # resize_identity (channel change) -> fused shortcut
        (2, 8, 8, 16, 16, 1),   # identity pass-through path
        (2, 4, 8, 16, 16, 2),   # strided + resize_identity
    ]
    for idx, (B, in_c, out_c, H, W, stride) in enumerate(configs):
        kx, kp = jax.random.split(jax.random.fold_in(key, idx))
        x = jax.random.normal(kx, (B, in_c, H, W), jnp.float32)   # NCHW like PyTorch
        params = init_params(kp, in_c, out_c)

        out = jax.block_until_ready(
            shake_shake_res_unit(x, params, stride=stride, matmul_dtype=matmul_dtype))
        ref = jax.block_until_ready(ref_forward(x, params, stride))

        assert out.shape == (B, out_c, H // stride, W // stride), out.shape
        assert bool(jnp.all(jnp.isfinite(out)))
        assert bool(jnp.allclose(out, ref, rtol=tol, atol=tol)), (
            idx, float(jnp.max(jnp.abs(out - ref))))

    print("KERNEL_OK")
</pallas_src>

<mosaic_0001>
module attributes {stable_mosaic.version = 11 : i64} {
  func.func @_fused_unit_kernel(%arg0: i32, %arg1: memref<1x36x256xf32, #tpu.memory_space<vmem>>, %arg2: memref<16x36xf32, #tpu.memory_space<vmem>>, %arg3: memref<16x1xf32, #tpu.memory_space<vmem>>, %arg4: memref<8x144xf32, #tpu.memory_space<vmem>>, %arg5: memref<8x1xf32, #tpu.memory_space<vmem>>, %arg6: memref<2x256xf32, #tpu.memory_space<vmem>>, %arg7: memref<1x8x256xf32, #tpu.memory_space<vmem>>, %arg8: memref<8x8xf32, #tpu.memory_space<vmem>>, %arg9: memref<8x1xf32, #tpu.memory_space<vmem>>, %arg10: memref<1x8x256xf32, #tpu.memory_space<vmem>>) attributes {dimension_semantics = [#tpu.dimension_semantics<parallel>], iteration_bounds = array<i64: 2>, scalar_prefetch = 0 : i64, scratch_operands = 0 : i64, tpu.core_type = #tpu.core_type<tc>, window_params = [{transform_indices = @transform_0, window_bounds = array<i64: 1, 36, 256>}, {pipeline_mode = #tpu.pipeline_mode<synchronous>, transform_indices = @transform_1, window_bounds = array<i64: 16, 36>}, {pipeline_mode = #tpu.pipeline_mode<synchronous>, transform_indices = @transform_2, window_bounds = array<i64: 16, 1>}, {pipeline_mode = #tpu.pipeline_mode<synchronous>, transform_indices = @transform_3, window_bounds = array<i64: 8, 144>}, {pipeline_mode = #tpu.pipeline_mode<synchronous>, transform_indices = @transform_4, window_bounds = array<i64: 8, 1>}, {pipeline_mode = #tpu.pipeline_mode<synchronous>, transform_indices = @transform_5, window_bounds = array<i64: 2, 256>}, {transform_indices = @transform_6, window_bounds = array<i64: 1, 8, 256>}, {pipeline_mode = #tpu.pipeline_mode<synchronous>, transform_indices = @transform_7, window_bounds = array<i64: 8, 8>}, {pipeline_mode = #tpu.pipeline_mode<synchronous>, transform_indices = @transform_8, window_bounds = array<i64: 8, 1>}, {transform_indices = @transform_9, window_bounds = array<i64: 1, 8, 256>}]} {
    %c0 = arith.constant 0 : index
    %c0_0 = arith.constant 0 : index
    %0 = vector.load %arg2[%c0, %c0_0] : memref<16x36xf32, #tpu.memory_space<vmem>>, vector<16x36xf32>
    %c0_1 = arith.constant 0 : index
    %c0_2 = arith.constant 0 : index
    %c0_3 = arith.constant 0 : index
    %1 = vector.load %arg1[%c0_1, %c0_2, %c0_3] : memref<1x36x256xf32, #tpu.memory_space<vmem>>, vector<1x36x256xf32>
    %2 = vector.shape_cast %1 : vector<1x36x256xf32> to vector<36x256xf32>
    %cst = arith.constant dense<0.000000e+00> : vector<16x256xf32>
    %3 = tpu.matmul %0, %2, %cst {dimension_numbers = #tpu.dot_dimension_numbers<[1], [0], [0], [1], [0, 0, 1, 1], [], []>} : vector<16x36xf32>, vector<36x256xf32>, vector<16x256xf32> -> vector<16x256xf32>
    %c0_4 = arith.constant 0 : index
    %c0_5 = arith.constant 0 : index
    %4 = vector.load %arg3[%c0_4, %c0_5] : memref<16x1xf32, #tpu.memory_space<vmem>>, vector<16x1xf32>
    %5 = vector.broadcast %4 : vector<16x1xf32> to vector<16x256xf32>
    %6 = arith.addf %3, %5 : vector<16x256xf32>
    %cst_6 = arith.constant 0.000000e+00 : f32
    %7 = vector.broadcast %cst_6 : f32 to vector<16x256xf32>
    %8 = arith.maximumf %6, %7 : vector<16x256xf32>
    %cst_7 = arith.constant 0.000000e+00 : f32
    %9 = vector.broadcast %cst_7 : f32 to vector<16x17xf32>
    %10 = tpu.concatenate %9, %8, %9 in 1 : vector<16x17xf32>, vector<16x256xf32>, vector<16x17xf32> -> vector<16x290xf32>
    %c0_8 = arith.constant 0 : index
    %c0_9 = arith.constant 0 : index
    %11 = vector.load %arg6[%c0_8, %c0_9] : memref<2x256xf32, #tpu.memory_space<vmem>>, vector<2x256xf32>
    %12 = vector.extract_strided_slice %11 {offsets = [0, 0], sizes = [1, 256], strides = [1, 1]} : vector<2x256xf32> to vector<1x256xf32>
    %13 = vector.extract_strided_slice %11 {offsets = [1, 0], sizes = [1, 256], strides = [1, 1]} : vector<2x256xf32> to vector<1x256xf32>
    %14 = vector.extract_strided_slice %10 {offsets = [0, 0], sizes = [16, 256], strides = [1, 1]} : vector<16x290xf32> to vector<16x256xf32>
    %15 = vector.broadcast %12 : vector<1x256xf32> to vector<16x256xf32>
    %16 = arith.mulf %14, %15 : vector<16x256xf32>
    %17 = vector.extract_strided_slice %10 {offsets = [0, 1], sizes = [16, 256], strides = [1, 1]} : vector<16x290xf32> to vector<16x256xf32>
    %18 = vector.extract_strided_slice %10 {offsets = [0, 2], sizes = [16, 256], strides = [1, 1]} : vector<16x290xf32> to vector<16x256xf32>
    %19 = vector.broadcast %13 : vector<1x256xf32> to vector<16x256xf32>
    %20 = arith.mulf %18, %19 : vector<16x256xf32>
    %21 = vector.extract_strided_slice %10 {offsets = [0, 16], sizes = [16, 256], strides = [1, 1]} : vector<16x290xf32> to vector<16x256xf32>
    %22 = vector.broadcast %12 : vector<1x256xf32> to vector<16x256xf32>
    %23 = arith.mulf %21, %22 : vector<16x256xf32>
    %24 = vector.extract_strided_slice %10 {offsets = [0, 17], sizes = [16, 256], strides = [1, 1]} : vector<16x290xf32> to vector<16x256xf32>
    %25 = vector.extract_strided_slice %10 {offsets = [0, 18], sizes = [16, 256], strides = [1, 1]} : vector<16x290xf32> to vector<16x256xf32>
    %26 = vector.broadcast %13 : vector<1x256xf32> to vector<16x256xf32>
    %27 = arith.mulf %25, %26 : vector<16x256xf32>
    %28 = vector.extract_strided_slice %10 {offsets = [0, 32], sizes = [16, 256], strides = [1, 1]} : vector<16x290xf32> to vector<16x256xf32>
    %29 = vector.broadcast %12 : vector<1x256xf32> to vector<16x256xf32>
    %30 = arith.mulf %28, %29 : vector<16x256xf32>
    %31 = vector.extract_strided_slice %10 {offsets = [0, 33], sizes = [16, 256], strides = [1, 1]} : vector<16x290xf32> to vector<16x256xf32>
    %32 = vector.extract_strided_slice %10 {offsets = [0, 34], sizes = [16, 256], strides = [1, 1]} : vector<16x290xf32> to vector<16x256xf32>
    %33 = vector.broadcast %13 : vector<1x256xf32> to vector<16x256xf32>
    %34 = arith.mulf %32, %33 : vector<16x256xf32>
    %35 = tpu.concatenate %16, %17, %20, %23, %24, %27, %30, %31, %34 in 0 : vector<16x256xf32>, vector<16x256xf32>, vector<16x256xf32>, vector<16x256xf32>, vector<16x256xf32>, vector<16x256xf32>, vector<16x256xf32>, vector<16x256xf32>, vector<16x256xf32> -> vector<144x256xf32>
    %c0_10 = arith.constant 0 : index
    %c0_11 = arith.constant 0 : index
    %36 = vector.load %arg4[%c0_10, %c0_11] : memref<8x144xf32, #tpu.memory_space<vmem>>, vector<8x144xf32>
    %cst_12 = arith.constant dense<0.000000e+00> : vector<8x256xf32>
    %37 = tpu.matmul %36, %35, %cst_12 {dimension_numbers = #tpu.dot_dimension_numbers<[1], [0], [0], [1], [0, 0, 1, 1], [], []>} : vector<8x144xf32>, vector<144x256xf32>, vector<8x256xf32> -> vector<8x256xf32>
    %c0_13 = arith.constant 0 : index
    %c0_14 = arith.constant 0 : index
    %38 = vector.load %arg5[%c0_13, %c0_14] : memref<8x1xf32, #tpu.memory_space<vmem>>, vector<8x1xf32>
    %39 = vector.broadcast %38 : vector<8x1xf32> to vector<8x256xf32>
    %40 = arith.addf %37, %39 : vector<8x256xf32>
    %c0_15 = arith.constant 0 : index
    %c0_16 = arith.constant 0 : index
    %41 = vector.load %arg8[%c0_15, %c0_16] : memref<8x8xf32, #tpu.memory_space<vmem>>, vector<8x8xf32>
    %c0_17 = arith.constant 0 : index
    %c0_18 = arith.constant 0 : index
    %c0_19 = arith.constant 0 : index
    %42 = vector.load %arg7[%c0_17, %c0_18, %c0_19] : memref<1x8x256xf32, #tpu.memory_space<vmem>>, vector<1x8x256xf32>
    %43 = vector.shape_cast %42 : vector<1x8x256xf32> to vector<8x256xf32>
    %cst_20 = arith.constant dense<0.000000e+00> : vector<8x256xf32>
    %44 = tpu.matmul %41, %43, %cst_20 {dimension_numbers = #tpu.dot_dimension_numbers<[1], [0], [0], [1], [0, 0, 1, 1], [], []>} : vector<8x8xf32>, vector<8x256xf32>, vector<8x256xf32> -> vector<8x256xf32>
    %c0_21 = arith.constant 0 : index
    %c0_22 = arith.constant 0 : index
    %45 = vector.load %arg9[%c0_21, %c0_22] : memref<8x1xf32, #tpu.memory_space<vmem>>, vector<8x1xf32>
    %46 = vector.broadcast %45 : vector<8x1xf32> to vector<8x256xf32>
    %47 = arith.addf %44, %46 : vector<8x256xf32>
    %48 = arith.addf %40, %47 : vector<8x256xf32>
    %cst_23 = arith.constant 0.000000e+00 : f32
    %49 = vector.broadcast %cst_23 : f32 to vector<8x256xf32>
    %50 = arith.maximumf %48, %49 : vector<8x256xf32>
    %c0_24 = arith.constant 0 : index
    %c0_25 = arith.constant 0 : index
    %c0_26 = arith.constant 0 : index
    %51 = vector.load %arg10[%c0_24, %c0_25, %c0_26] : memref<1x8x256xf32, #tpu.memory_space<vmem>>, vector<1x8x256xf32>
    %52 = vector.shape_cast %51 : vector<1x8x256xf32> to vector<8x256xf32>
    %53 = vector.shape_cast %50 : vector<8x256xf32> to vector<1x8x256xf32>
    tpu.vector_store %arg10[%c0_24, %c0_25, %c0_26], %53 {strides = array<i32>} : memref<1x8x256xf32, #tpu.memory_space<vmem>>, vector<1x8x256xf32>,
    return
  }
  func.func @transform_0(%arg0: i32) -> (i32, i32, i32) {
    %c0_i32 = arith.constant 0 : i32
    %c0_i32_0 = arith.constant 0 : i32
    %c0_i32_1 = arith.constant 0 : i32
    return %arg0, %c0_i32, %c0_i32_0 : i32, i32, i32
  }
  func.func @transform_1(%arg0: i32) -> (i32, i32) {
    %c0_i32 = arith.constant 0 : i32
    %c0_i32_0 = arith.constant 0 : i32
    %c0_i32_1 = arith.constant 0 : i32
    return %c0_i32, %c0_i32_0 : i32, i32
  }
  func.func @transform_2(%arg0: i32) -> (i32, i32) {
    %c0_i32 = arith.constant 0 : i32
    %c0_i32_0 = arith.constant 0 : i32
    %c0_i32_1 = arith.constant 0 : i32
    return %c0_i32, %c0_i32_0 : i32, i32
  }
  func.func @transform_3(%arg0: i32) -> (i32, i32) {
    %c0_i32 = arith.constant 0 : i32
    %c0_i32_0 = arith.constant 0 : i32
    %c0_i32_1 = arith.constant 0 : i32
    return %c0_i32, %c0_i32_0 : i32, i32
  }
  func.func @transform_4(%arg0: i32) -> (i32, i32) {
    %c0_i32 = arith.constant 0 : i32
    %c0_i32_0 = arith.constant 0 : i32
    %c0_i32_1 = arith.constant 0 : i32
    return %c0_i32, %c0_i32_0 : i32, i32
  }
  func.func @transform_5(%arg0: i32) -> (i32, i32) {
    %c0_i32 = arith.constant 0 : i32
    %c0_i32_0 = arith.constant 0 : i32
    %c0_i32_1 = arith.constant 0 : i32
    return %c0_i32, %c0_i32_0 : i32, i32
  }
  func.func @transform_6(%arg0: i32) -> (i32, i32, i32) {
    %c0_i32 = arith.constant 0 : i32
    %c0_i32_0 = arith.constant 0 : i32
    %c0_i32_1 = arith.constant 0 : i32
    return %arg0, %c0_i32, %c0_i32_0 : i32, i32, i32
  }
  func.func @transform_7(%arg0: i32) -> (i32, i32) {
    %c0_i32 = arith.constant 0 : i32
    %c0_i32_0 = arith.constant 0 : i32
    %c0_i32_1 = arith.constant 0 : i32
    return %c0_i32, %c0_i32_0 : i32, i32
  }
  func.func @transform_8(%arg0: i32) -> (i32, i32) {
    %c0_i32 = arith.constant 0 : i32
    %c0_i32_0 = arith.constant 0 : i32
    %c0_i32_1 = arith.constant 0 : i32
    return %c0_i32, %c0_i32_0 : i32, i32
  }
  func.func @transform_9(%arg0: i32) -> (i32, i32, i32) {
    %c0_i32 = arith.constant 0 : i32
    %c0_i32_0 = arith.constant 0 : i32
    %c0_i32_1 = arith.constant 0 : i32
    return %arg0, %c0_i32, %c0_i32_0 : i32, i32, i32
  }
}

</mosaic_0001>

<bundles_post_ra>
// kernel: shake_shake_res_unit.1
= control target key start
LH: loop header
LB: loop body
LE: loop exit
PB: predicated region body
PF: predicated region fallthrough
CT: control target
= control target key end

     0   :  { %s1350_s30 = smov 0   ;;  %s1526_s0 = inlined_call_operand.vmem [shape: f32[2,36,256], index: 0, kind: input, shape index: {}]   ;;  %s1527_s1 = inlined_call_operand.vmem [shape: f32[16,36], index: 1, kind: input, shape index: {}]   ;;  %s1528_s2 = inlined_call_operand.vmem [shape: f32[16,1], index: 2, kind: input, shape index: {}]   ;;  %s1529_s3 = inlined_call_operand.vmem [shape: f32[8,144], index: 3, kind: input, shape index: {}]   ;;  %s1530_s4 = inlined_call_operand.vmem [shape: f32[8,1], index: 4, kind: input, shape index: {}]   ;;  %s1531_s5 = inlined_call_operand.vmem [shape: f32[2,256], index: 5, kind: input, shape index: {}]   ;;  %s1532_s6 = inlined_call_operand.vmem [shape: f32[2,8,256], index: 6, kind: input, shape index: {}]   ;;  %s1533_s7 = inlined_call_operand.vmem [shape: f32[8,8], index: 7, kind: input, shape index: {}]   ;;  %s1534_s8 = inlined_call_operand.vmem [shape: f32[8,1], index: 8, kind: input, shape index: {}]   ;;  %s1535_s9 = inlined_call_operand.vmem [shape: f32[2,8,256], index: 9, kind: output, shape index: {}]  }
   0x1 LB: > { %s1059_s10 = sadd.s32 4294967295, %s1282_s30   ;;  %p1063_p0 = scmp.ge.s32.totalorder %s1282_s30, 1  ;;  %s1282_s30 = sphi %s1350_s30, %s19_s30  }
   0x2   : > { %p297_p1 = scmp.lt.s32.totalorder %s1282_s30, 3 }
   0x4   : > { %p298_p2 = pnand %p1063_p0, %p297_p1 }
   0x5   : > { %p338_p3 = scmp.lt.s32.totalorder (!%p298_p2), %s1059_s10, 1  ;;  %v1284_v0 = vmov (!%p298_p2), 0.0   ;;  %v365_v1 = vld [vmem:[%s1528_s2] sm:$0xff] (!%p298_p2)  ;;  %v1285_v2 = vmov (!%p298_p2), 0   ;;  %v366_v3 = vld [vmem:[%s1528_s2 + $0x8] sm:$0xff] (!%p298_p2)  ;;  %vm384_vm0 = vcmask (!%p298_p2), 1043456   ;;  %v499_v20 = vlaneseq (!%p298_p2) }
   0x6   : > { %301 = sbr.rel (%p298_p2) target bundleno = 768 (0x300), region = 56  ;;  %455 = vmatprep.mubr.f32.mxu0 (!%p298_p2), %v1284_v0  ;;  %1154 = vset.pattern.permute.xlu0 (!%p298_p2), %v1285_v2  ;;  %v353_v18 = vld [vmem:[%s1527_s1] sm:$0xff] (!%p298_p2)  ;;  %vm377_vm1 = vcmask (!%p298_p2), 293888   ;;  %v354_v19 = vld [vmem:[%s1527_s1 + $0x8] sm:$0xff] (!%p298_p2)  ;;  %s1286_s25 = smov (!%p298_p2), 17   ;;  %vm484_vm2 = vcmask (!%p298_p2), 138240  }
   0x7   : > { %1275 = vset.pattern.permute.xlu1 (!%p298_p2), %v1285_v2  ;;  %369 = vperm.xlu0 (!%p298_p2), %1154, %v365_v1   ;;  %v500_v21 = vshrl.u32 (!%p298_p2), %v499_v20, 7  ;;  %v497_v27 = vld [vmem:[%s1531_s5] sm:$0xf] (!%p298_p2)  ;;  %s1287_s26 = smov (!%p298_p2), 2   ;;  %s1288_s27 = smov (!%p298_p2), 16   ;;  %vm545_vm3 = vcmask (!%p298_p2), 15360  }
   0x8   : > { %s1289_s28 = smov (!%p298_p2), 18   ;;  %s1290_s29 = smov (!%p298_p2), 32   ;;  %vm562_vm4 = vcmask (!%p298_p2), 130048   ;;  %vm592_vm5 = vcmask (!%p298_p2), 261120   ;;  %vm577_vm6 = vcmask (!%p298_p2), 146432   ;;  %vm607_vm7 = vcmask (!%p298_p2), 277504  }
   0x9   : > { %v523_v26 = vsub.s32 (!%p298_p2), 1, %v500_v21  ;;  %v501_v35 = vsub.s32 (!%p298_p2), 0, %v500_v21  ;;  %v527_v36 = vsub.s32 (!%p298_p2), 3, %v500_v21  ;;  %v505_v43 = vsub.s32 (!%p298_p2), 2, %v500_v21  ;;  %s1291_s11 = smov (!%p298_p2), 34   ;;  %s1292_s12 = smov (!%p298_p2), 111  }
   0xa   : > { %s1294_s14 = smov (!%p298_p2), 126   ;;  %s1295_s15 = smov (!%p298_p2), 112   ;;  %vm911_vm8 = vcmask (!%p298_p2), 64512   ;;  %vm634_vm9 = vcmask (!%p298_p2), 1039360   ;;  %vm661_vm10 = vcmask (!%p298_p2), 1031168   ;;  %vm688_vm11 = vcmask (!%p298_p2), 916480  }
   0xb   : > { %374 = vperm.xlu0 (!%p298_p2), %1154, %v366_v3   ;;  %v524_v34 = vrot.slane (!%p298_p2), %v497_v27, %v523_v26  ;;  %v502_v41 = vrot.slane (!%p298_p2), %v497_v27, %v501_v35  ;;  %v528_v42 = vrot.slane (!%p298_p2), %v497_v27, %v527_v36  ;;  %v506_v47 = vrot.slane (!%p298_p2), %v497_v27, %v505_v43  ;;  %s1296_s16 = smov (!%p298_p2), 96   ;;  %s1297_s17 = smov (!%p298_p2), 110  }
   0xc   : > { %s1299_s23 = smov (!%p298_p2), 94   ;;  %vm709_vm12 = vcmask (!%p298_p2), 908288   ;;  %vm736_vm13 = vcmask (!%p298_p2), 900096   ;;  %vm763_vm14 = vcmask (!%p298_p2), 785408   ;;  %vm784_vm15 = vcmask (!%p298_p2), 777216  }
   0xd   : > { %s1537_s10 = smov (!%p338_p3, %s1059_s10), 1  ;;  %v534_v40 = vrot.slane %v524_v34, %v523_v26  ;;  %v512_v45 = vrot.slane %v502_v41, %v501_v35  ;;  %v538_v46 = vrot.slane %v528_v42, %v523_v26  ;;  %v516_v48 = vrot.slane %v506_v47, %v501_v35 }
   0xe   : > { %s1129_s13 = smul.u32 80, %s1537_s10  ;;  %s1077_s19 = sshll.u32 %s1537_s10, 4 }
   0xf   : > { %s347_s22 = scalar_lea.vmem %s1532_s6, %s1077_s19 }
  0x10   : > { %s342_s18 = scalar_lea.vmem %s1526_s0, %s1129_s13  ;;  %s1293_s13 = smov 127  }
  0x11   : > { %v356_v4 = vld [vmem:[%s342_s18 + $0x8] sm:$0xff]  ;;  %v358_v5 = vld [vmem:[%s342_s18 + $0x18] sm:$0xff]  ;;  %v355_v6 = vld [vmem:[%s342_s18] sm:$0xff] }
  0x12   : > { %v1079_v7 = vpack.c.bf16 %v358_v5, %v356_v4  ;;  %v357_v8 = vld [vmem:[%s342_s18 + $0x10] sm:$0xff]  ;;  %v360_v9 = vld [vmem:[%s342_s18 + $0x28] sm:$0xff]  ;;  %v362_v10 = vld [vmem:[%s342_s18 + $0x38] sm:$0xff] }
  0x13   : > { %v1081_v11 = vpack.c.bf16 %v357_v8, %v355_v6  ;;  %v1083_v12 = vpack.c.bf16 %v362_v10, %v360_v9  ;;  %v359_v13 = vld [vmem:[%s342_s18 + $0x20] sm:$0xff]  ;;  %v361_v14 = vld [vmem:[%s342_s18 + $0x30] sm:$0xff]  ;;  %v364_v16 = vld [vmem:[%s342_s18 + $0x48] sm:$0xf] }
  0x14   : > { %1080 = vmatprep.subr.bf16.mxu0 %v1079_v7  ;;  %v1085_v15 = vpack.c.bf16 %v361_v14, %v359_v13  ;;  %v363_v17 = vld [vmem:[%s342_s18 + $0x40] sm:$0xf]  ;;  %s1298_s18 = smov 95  }
  0x15   : > { %1082 = vmatpush1.bf16.msra.mxu0 %v1081_v11 }
  0x16   : > { %1084 = vmatprep.subr.bf16.mxu0 %v1083_v12 }
  0x19   : > { %1086 = vmatpush1.bf16.msra.mxu0 %v1085_v15 }
  0x1a   : > { %1069 = vmatprep.subr.msk.mxu0 %vm384_vm0, %v364_v16 }
  0x1d   : > { %1070 = vmatpush1.msk.msra.mxu0 %vm384_vm0, %v363_v17  ;;  %vm811_vm0 = vcmask 769024  }
  0x1e   : > { %1071 = vmatmul.mubr.msk.f32.vlgmr.msra.gmra.mrb[0].mxu0 %vm377_vm1, %v353_v18 }
  0x1f   : > { %461 = vmatprep.mubr.f32.mxu0 %v1284_v0 }
  0x22   : > { %1072 = vmatmul.mubr.msk.f32.gmra.mrb[2].mxu0 %vm377_vm1, %v354_v19 }
  0x23   : > { %979 = vmatprep.mubr.f32.mxu0 %v1284_v0 }
  0x86   : > { %v370_v22 = vpop.permute.xlu0 %369 }
  0x8a   : > { %v375_v30 = vpop.permute.xlu0 %374 }
  0xf1   : > { %v457_v23 = vpop.f32.mrb[0].mxu0 }
  0xf2   : > { %v458_v24 = vadd.f32 %v457_v23, %v370_v22  ;;  %v459_v25 = vpop.f32.mrb[1].mxu0 }
  0xf3   : > { %v460_v29 = vadd.f32 %v459_v25, %v370_v22 }
  0xf4   : > { %v468_v28 = vmax.f32 %v458_v24, 0.0 }
  0xf5   : > { %v463_v31 = vpop.f32.mrb[2].mxu0  ;;  %v469_v37 = vmax.f32 %v460_v29, 0.0 }
  0xf6   : > { %v464_v32 = vadd.f32 %v463_v31, %v375_v30  ;;  %v465_v33 = vpop.f32.mrb[3].mxu0  ;;  %476 = vrot.lane.b32.xlu1 %v468_v28, %s1286_s25 }
  0xf7   : > { %v466_v39 = vadd.f32 %v465_v33, %v375_v30 }
  0xf8   : > { %v470_v38 = vmax.f32 %v464_v32, 0.0 }
  0xf9   : > { %v471_v44 = vmax.f32 %v466_v39, 0.0 }
  0xfa   : > { %480 = vrot.lane.b32.xlu0 %v470_v38, %s1286_s25  ;;  %478 = vrot.lane.b32.xlu1 %v469_v37, %s1286_s25 }
  0xfe   : > { %541 = vrot.lane.b32.xlu0 %v534_v40, %s1287_s26  ;;  %482 = vrot.lane.b32.xlu1 %v471_v44, %s1286_s25 }
 0x102   : > { %558 = vrot.lane.b32.xlu0 %v512_v45, %s1288_s27  ;;  %543 = vrot.lane.b32.xlu1 %v538_v46, %s1287_s26 }
 0x106   : > { %573 = vrot.lane.b32.xlu0 %v534_v40, %s1289_s28  ;;  %560 = vrot.lane.b32.xlu1 %v516_v48, %s1288_s27 }
 0x10a   : > { %588 = vrot.lane.b32.xlu0 %v512_v45, %s1290_s29  ;;  %575 = vrot.lane.b32.xlu1 %v538_v46, %s1289_s28 }
 0x10e   : > { %603 = vrot.lane.b32.xlu0 %v534_v40, %s1291_s11  ;;  %590 = vrot.lane.b32.xlu1 %v516_v48, %s1290_s29 }
 0x112   : > { %605 = vrot.lane.b32.xlu1 %v538_v46, %s1291_s11 }
 0x168   : > { %v477_v49 = vpop.permute.xlu1 %476 }
 0x169   : > { %v1393_v56 = vsel %vm484_vm2, 0.0, %v477_v49 }
 0x16a   : > { %v517_v63 = vmul.f32 %v512_v45, %v1393_v56 }
 0x16c   : > { %v481_v50 = vpop.permute.xlu0 %480  ;;  %v479_v51 = vpop.permute.xlu1 %478 }
 0x16d   : > { %v1380_v52 = vsel %vm484_vm2, %v477_v49, %v479_v51  ;;  %v1383_v53 = vsel %vm484_vm2, %v479_v51, 0.0  ;;  %v1386_v54 = vsel %vm484_vm2, 0.0, %v481_v50 }
 0x16e   : > { %v1390_v55 = vpack.i.bf16 %v1383_v53, %v1380_v52  ;;  %v519_v59 = vmul.f32 %v512_v45, %v1386_v54  ;;  %v518_v61 = vmul.f32 %v516_v48, %v1380_v52  ;;  %v1414_v13 = vpack.i.bf16 %v1386_v54, %v1393_v56 }
 0x170   : > { %1161 = vrot.lane.b32.xlu1 %v1390_v55, %s1292_s12  ;;  %1156 = vrot.lane.b32.xlu0 %v1390_v55, %s1293_s13  ;;  %v483_v57 = vpop.permute.xlu1 %482  ;;  %v542_v60 = vpop.permute.xlu0 %541  ;;  %v1089_v4 = vpack.c.bf16 %v519_v59, %v517_v63 }
 0x171   : > { %v1400_v58 = vsel %vm484_vm2, %v481_v50, %v483_v57  ;;  %v1417_v15 = vsel %vm484_vm2, %v483_v57, 0.0  ;;  %v550_v17 = vmul.f32 %v542_v60, %v1393_v56  ;;  %v553_v18 = vmul.f32 %v542_v60, %v1386_v54 }
 0x172   : > { %v520_v62 = vmul.f32 %v516_v48, %v1400_v58  ;;  %v1185_v19 = vpack.i.bf16 %v1417_v15, %v1400_v58 }
 0x173   : > { %v1195_v21 = vpack.i.bf16 %v553_v18, %v550_v17 }
 0x174   : > { %v544_v0 = vpop.permute.xlu1 %543  ;;  %v1087_v1 = vpack.c.bf16 %v520_v62, %v518_v61  ;;  %v559_v6 = vpop.permute.xlu0 %558 }
 0x175   : > { %v546_v2 = vsel %vm545_vm3, %v542_v60, %v544_v0  ;;  %v552_v3 = vmul.f32 %v544_v0, %v1383_v53  ;;  %v567_v22 = vmul.f32 %v559_v6, %v1393_v56  ;;  %v570_v23 = vmul.f32 %v559_v6, %v1386_v54 }
 0x176   : > { %v551_v5 = vmul.f32 %v546_v2, %v1380_v52  ;;  %1088 = vmatprep.subr.bf16.mxu1 %v1087_v1  ;;  %v554_v28 = vmul.f32 %v546_v2, %v1400_v58  ;;  %v555_v29 = vmul.f32 %v544_v0, %v1417_v15  ;;  %v904_v2 = vld [vmem:[%s347_s22 + $0x8] sm:$0xff] }
 0x177   : > { %1090 = vmatpush1.bf16.msra.mxu1 %v1089_v4  ;;  %v1200_v33 = vpack.i.bf16 %v570_v23, %v567_v22  ;;  %915 = vmatprep.subr.mxu0 %v904_v2 }
 0x178   : > { %v561_v7 = vpop.permute.xlu1 %560  ;;  %v1165_v8 = vpack.i.bf16 %v552_v3, %v551_v5  ;;  %v574_v16 = vpop.permute.xlu0 %573  ;;  %v1205_v36 = vpack.i.bf16 %v555_v29, %v554_v28  ;;  %v902_v3 = vld [vmem:[%s1533_s7] sm:$0xff] }
 0x179   : > { %v563_v9 = vsel %vm562_vm4, %v559_v6, %v561_v7  ;;  %v569_v10 = vmul.f32 %v561_v7, %v1383_v53  ;;  %v572_v25 = vmul.f32 %v561_v7, %v1417_v15  ;;  %v582_v41 = vmul.f32 %v574_v16, %v1393_v56  ;;  %v905_v5 = vld [vmem:[%s1534_s8] sm:$0xff] }
 0x17a   : > { %v568_v11 = vmul.f32 %v563_v9, %v1380_v52  ;;  %1166 = vrot.lane.b32.xlu1 %v1165_v8, %s1294_s14  ;;  %v571_v24 = vmul.f32 %v563_v9, %v1400_v58  ;;  %v585_v42 = vmul.f32 %v574_v16, %v1386_v54 }
 0x17c   : > { %v576_v12 = vpop.permute.xlu1 %575  ;;  %v1170_v14 = vpack.i.bf16 %v569_v10, %v568_v11  ;;  %v589_v26 = vpop.permute.xlu0 %588  ;;  %v1220_v32 = vpack.i.bf16 %v572_v25, %v571_v24  ;;  %v1215_v49 = vpack.i.bf16 %v585_v42, %v582_v41 }
 0x17d   : > { %v578_v34 = vsel %vm577_vm6, %v574_v16, %v576_v12  ;;  %v584_v35 = vmul.f32 %v576_v12, %v1383_v53  ;;  %v587_v39 = vmul.f32 %v576_v12, %v1417_v15  ;;  %v597_v43 = vmul.f32 %v589_v26, %v1393_v56 }
 0x17e   : > { %1181 = vrot.lane.b32.xlu1 %v1414_v13, %s1292_s12  ;;  %1171 = vrot.lane.b32.xlu0 %v1170_v14, %s1295_s15  ;;  %v583_v37 = vmul.f32 %v578_v34, %v1380_v52  ;;  %v586_v38 = vmul.f32 %v578_v34, %v1400_v58  ;;  %v600_v44 = vmul.f32 %v589_v26, %v1386_v54 }
 0x180   : > { %v591_v20 = vpop.permute.xlu1 %590  ;;  %v1210_v45 = vpack.i.bf16 %v584_v35, %v583_v37  ;;  %v1230_v46 = vpack.i.bf16 %v587_v39, %v586_v38  ;;  %v604_v48 = vpop.permute.xlu0 %603  ;;  %v1235_v50 = vpack.i.bf16 %v600_v44, %v597_v43 }
 0x181   : > { %v593_v27 = vsel %vm592_vm5, %v589_v26, %v591_v20  ;;  %v599_v31 = vmul.f32 %v591_v20, %v1383_v53  ;;  %v602_v59 = vmul.f32 %v591_v20, %v1417_v15  ;;  %v612_v62 = vmul.f32 %v604_v48, %v1393_v56 }
 0x182   : > { %1186 = vrot.lane.b32.xlu1 %v1185_v19, %s1293_s13  ;;  %1176 = vrot.lane.b32.xlu0 %v1414_v13, %s1293_s13  ;;  %v598_v30 = vmul.f32 %v593_v27, %v1380_v52  ;;  %v601_v57 = vmul.f32 %v593_v27, %v1400_v58  ;;  %v615_v63 = vmul.f32 %v604_v48, %v1386_v54 }
 0x184   : > { %v1225_v40 = vpack.i.bf16 %v599_v31, %v598_v30  ;;  %v606_v47 = vpop.permute.xlu1 %605  ;;  %v1250_v0 = vpack.i.bf16 %v602_v59, %v601_v57  ;;  %v1270_v56 = vpack.i.bf16 %v615_v63, %v612_v62 }
 0x185   : > { %v608_v51 = vsel %vm607_vm7, %v604_v48, %v606_v47  ;;  %v614_v61 = vmul.f32 %v606_v47, %v1383_v53  ;;  %v821_v53 = vld [vmem:[%s1529_s3 + $0x8] sm:$0xff] }
 0x186   : > { %1196 = vrot.lane.b32.xlu1 %v1195_v21, %s1294_s14  ;;  %1191 = vrot.lane.b32.xlu0 %v1185_v19, %s1292_s12  ;;  %v613_v60 = vmul.f32 %v608_v51, %v1380_v52  ;;  %v903_v52 = vld [vmem:[%s347_s22] sm:$0xff]  ;;  %v616_v54 = vmul.f32 %v608_v51, %v1400_v58 }
 0x187   : > { %916 = vmatpush1.msra.mxu0 %v903_v52  ;;  %1073 = vmatprep.mubr.msk.f32.mxu1 %vm562_vm4, %v821_v53  ;;  %v822_v58 = vld [vmem:[%s1530_s4] sm:$0xff] }
 0x188   : > { %v1260_v1 = vpack.i.bf16 %v614_v61, %v613_v60  ;;  %1074 = vmatmul.mubr.msk.f32.vlgmr.msra.gmra.mrb[4].mxu0 %vm911_vm8, %v902_v3 }
 0x18a   : > { %1221 = vrot.lane.b32.xlu1 %v1220_v32, %s1295_s15  ;;  %1201 = vrot.lane.b32.xlu0 %v1200_v33, %s1295_s15 }
 0x18e   : > { %1206 = vrot.lane.b32.xlu0 %v1205_v36, %s1294_s14  ;;  %1226 = vrot.lane.b32.xlu1 %v1225_v40, %s1296_s16 }
 0x192   : > { %1211 = vrot.lane.b32.xlu0 %v1210_v45, %s1297_s17  ;;  %1231 = vrot.lane.b32.xlu1 %v1230_v46, %s1297_s17 }
 0x196   : > { %1216 = vrot.lane.b32.xlu0 %v1215_v49, %s1297_s17  ;;  %1236 = vrot.lane.b32.xlu1 %v1235_v50, %s1296_s16  ;;  %s352_s17 = scalar_lea.vmem %s1535_s9, %s1077_s19 }
 0x19a   : > { %1241 = vrot.lane.b32.xlu0 %v1390_v55, %s1298_s18  ;;  %1246 = vrot.lane.b32.xlu1 %v1185_v19, %s1298_s18  ;;  %v617_v55 = vmul.f32 %v606_v47, %v1417_v15 }
 0x19c   : > { %v1265_v4 = vpack.i.bf16 %v617_v55, %v616_v54 }
 0x19e   : > { %1251 = vrot.lane.b32.xlu0 %v1250_v0, %s1296_s16  ;;  %1261 = vrot.lane.b32.xlu1 %v1260_v1, %s1299_s23 }
 0x1a2   : > { %1256 = vrot.lane.b32.xlu0 %v1414_v13, %s1298_s18  ;;  %1271 = vrot.lane.b32.xlu1 %v1270_v56, %s1299_s23 }
 0x1a6   : > { %1266 = vrot.lane.b32.xlu0 %v1265_v4, %s1299_s23  ;;  %908 = vperm.xlu1 %1275, %v905_v5  }
 0x1aa   : > { %825 = vperm.xlu0 %1154, %v822_v58  }
 0x1e2   : > { %v1479_v6 = vpop.permute.xlu1 %1161  ;;  %v1157_v7 = vpop.permute.xlu0 %1156 }
 0x1e3   : > { %v1159_v11 = vunpack.i.h.bf16 %v1157_v7  ;;  %v1158_v12 = vunpack.i.l.bf16 %v1157_v7  ;;  %v1164_v60 = vunpack.i.h.bf16 %v1479_v6  ;;  %v1163_v61 = vunpack.i.l.bf16 %v1479_v6 }
 0x1e5   : > { %v636_v19 = vsel %vm634_vm9, %v1158_v12, %v1159_v11  ;;  %v711_v6 = vsel %vm709_vm12, %v1163_v61, %v1164_v60 }
 0x1ec   : > { %v1167_v8 = vpop.permute.xlu1 %1166 }
 0x1ed   : > { %v1169_v27 = vunpack.i.h.bf16 %v1167_v8  ;;  %v1168_v28 = vunpack.i.l.bf16 %v1167_v8 }
 0x1ef   : > { %v663_v37 = vsel %vm661_vm10, %v1168_v28, %v1169_v27 }
 0x1f0   : > { %v1172_v9 = vpop.permute.xlu0 %1171  ;;  %v1481_v10 = vpop.permute.xlu1 %1181 }
 0x1f1   : > { %v1174_v34 = vunpack.i.h.bf16 %v1172_v9  ;;  %v1173_v38 = vunpack.i.l.bf16 %v1172_v9  ;;  %v1184_v56 = vunpack.i.h.bf16 %v1481_v10  ;;  %v1183_v3 = vunpack.i.l.bf16 %v1481_v10 }
 0x1f3   : > { %v690_v62 = vsel %vm688_vm11, %v1173_v38, %v1174_v34  ;;  %v710_v10 = vsel %vm709_vm12, %v1183_v3, %v1163_v61 }
 0x1f4   : > { %v1177_v13 = vpop.permute.xlu0 %1176  ;;  %v1187_v14 = vpop.permute.xlu1 %1186 }
 0x1f5   : > { %v1179_v15 = vunpack.i.h.bf16 %v1177_v13  ;;  %v1178_v16 = vunpack.i.l.bf16 %v1177_v13  ;;  %v1189_v17 = vunpack.i.h.bf16 %v1187_v14  ;;  %v1188_v18 = vunpack.i.l.bf16 %v1187_v14 }
 0x1f7   : > { %v638_v20 = vsel %vm634_vm9, %v1188_v18, %v1189_v17  ;;  %v635_v21 = vsel %vm634_vm9, %v1178_v16, %v1158_v12  ;;  %v637_v22 = vsel %vm634_vm9, %v1179_v15, %v1188_v18 }
 0x1f8   : > { %v1192_v23 = vpop.permute.xlu0 %1191  ;;  %v1197_v24 = vpop.permute.xlu1 %1196  ;;  %v1091_v25 = vpack.c.bf16 %v638_v20, %v636_v19  ;;  %v1093_v26 = vpack.c.bf16 %v637_v22, %v635_v21 }
 0x1f9   : > { %v1198_v31 = vunpack.i.l.bf16 %v1197_v24  ;;  %v1199_v39 = vunpack.i.h.bf16 %v1197_v24  ;;  %v1194_v42 = vunpack.i.h.bf16 %v1192_v23  ;;  %v1193_v43 = vunpack.i.l.bf16 %v1192_v23 }
 0x1fa   : > { %1092 = vmatprep.subr.bf16.mxu1 %v1091_v25 }
 0x1fb   : > { %1094 = vmatpush1.bf16.msra.mxu1 %v1093_v26  ;;  %v662_v47 = vsel %vm661_vm10, %v1198_v31, %v1168_v28  ;;  %v713_v2 = vsel %vm709_vm12, %v1193_v43, %v1194_v42  ;;  %v712_v11 = vsel %vm709_vm12, %v1184_v56, %v1193_v43 }
 0x1fc   : > { %v1202_v29 = vpop.permute.xlu0 %1201  ;;  %v1222_v30 = vpop.permute.xlu1 %1221  ;;  %v1103_v9 = vpack.c.bf16 %v713_v2, %v711_v6  ;;  %v1105_v18 = vpack.c.bf16 %v712_v11, %v710_v10 }
 0x1fd   : > { %v1224_v32 = vunpack.i.h.bf16 %v1222_v30  ;;  %v1223_v33 = vunpack.i.l.bf16 %v1222_v30  ;;  %v1204_v44 = vunpack.i.h.bf16 %v1202_v29  ;;  %v1203_v45 = vunpack.i.l.bf16 %v1202_v29 }
 0x1ff   : > { %v692_v49 = vsel %vm688_vm11, %v1223_v33, %v1224_v32  ;;  %v689_v0 = vsel %vm688_vm11, %v1203_v45, %v1173_v38  ;;  %v691_v1 = vsel %vm688_vm11, %v1204_v44, %v1223_v33 }
 0x200   : > { %v1207_v35 = vpop.permute.xlu0 %1206  ;;  %v1483_v36 = vpop.permute.xlu1 %1226  ;;  %v1099_v63 = vpack.c.bf16 %v692_v49, %v690_v62  ;;  %v1101_v5 = vpack.c.bf16 %v691_v1, %v689_v0 }
 0x201   : > { %v1209_v40 = vunpack.i.h.bf16 %v1207_v35  ;;  %v1208_v41 = vunpack.i.l.bf16 %v1207_v35  ;;  %v1229_v16 = vunpack.i.h.bf16 %v1483_v36  ;;  %v1228_v17 = vunpack.i.l.bf16 %v1483_v36 }
 0x203   : > { %v665_v46 = vsel %vm661_vm10, %v1208_v41, %v1209_v40  ;;  %v664_v48 = vsel %vm661_vm10, %v1199_v39, %v1208_v41  ;;  %v765_v33 = vsel %vm763_vm14, %v1228_v17, %v1229_v16 }
 0x204   : > { %v1212_v50 = vpop.permute.xlu0 %1211  ;;  %v1232_v51 = vpop.permute.xlu1 %1231  ;;  %v1095_v57 = vpack.c.bf16 %v665_v46, %v663_v37  ;;  %v1097_v59 = vpack.c.bf16 %v664_v48, %v662_v47 }
 0x205   : > { %v1214_v52 = vunpack.i.h.bf16 %v1212_v50  ;;  %v1213_v53 = vunpack.i.l.bf16 %v1212_v50  ;;  %v1234_v54 = vunpack.i.h.bf16 %v1232_v51  ;;  %v1233_v55 = vunpack.i.l.bf16 %v1232_v51 }
 0x206   : > { %1096 = vmatprep.subr.bf16.mxu1 %v1095_v57 }
 0x207   : > { %1098 = vmatpush1.bf16.msra.mxu1 %v1097_v59  ;;  %v738_v12 = vsel %vm736_vm13, %v1213_v53, %v1214_v52  ;;  %v740_v13 = vsel %vm736_vm13, %v1233_v55, %v1234_v54 }
 0x208   : > { %v1217_v4 = vpop.permute.xlu0 %1216  ;;  %v1237_v58 = vpop.permute.xlu1 %1236  ;;  %1100 = vmatprep.subr.bf16.mxu1 %v1099_v63  ;;  %v1107_v20 = vpack.c.bf16 %v740_v13, %v738_v12 }
 0x209   : > { %v1219_v7 = vunpack.i.h.bf16 %v1217_v4  ;;  %v1218_v8 = vunpack.i.l.bf16 %v1217_v4  ;;  %v1238_v19 = vunpack.i.l.bf16 %v1237_v58  ;;  %v1239_v29 = vunpack.i.h.bf16 %v1237_v58 }
 0x20b   : > { %1102 = vmatpush1.bf16.msra.mxu1 %v1101_v5  ;;  %v737_v21 = vsel %vm736_vm13, %v1218_v8, %v1213_v53  ;;  %v739_v22 = vsel %vm736_vm13, %v1219_v7, %v1233_v55  ;;  %v764_v34 = vsel %vm763_vm14, %v1238_v19, %v1228_v17  ;;  %v820_v53 = vld [vmem:[%s1529_s3] sm:$0xff] }
 0x20c   : > { %v1242_v14 = vpop.permute.xlu0 %1241  ;;  %v1247_v15 = vpop.permute.xlu1 %1246  ;;  %1104 = vmatprep.subr.bf16.mxu1 %v1103_v9  ;;  %v1109_v32 = vpack.c.bf16 %v739_v22, %v737_v21 }
 0x20d   : > { %v1244_v23 = vunpack.i.h.bf16 %v1242_v14  ;;  %v1243_v24 = vunpack.i.l.bf16 %v1242_v14  ;;  %v1249_v25 = vunpack.i.h.bf16 %v1247_v15  ;;  %v1248_v26 = vunpack.i.l.bf16 %v1247_v15 }
 0x20f   : > { %1106 = vmatpush1.bf16.msra.mxu1 %v1105_v18  ;;  %v786_v37 = vsel %vm784_vm15, %v1243_v24, %v1244_v23  ;;  %v788_v38 = vsel %vm784_vm15, %v1248_v26, %v1249_v25 }
 0x210   : > { %v1252_v27 = vpop.permute.xlu0 %1251  ;;  %v1262_v28 = vpop.permute.xlu1 %1261  ;;  %1108 = vmatprep.subr.bf16.mxu1 %v1107_v20  ;;  %v1115_v46 = vpack.c.bf16 %v788_v38, %v786_v37 }
 0x211   : > { %v1254_v30 = vunpack.i.h.bf16 %v1252_v27  ;;  %v1253_v31 = vunpack.i.l.bf16 %v1252_v27  ;;  %v1264_v45 = vunpack.i.h.bf16 %v1262_v28  ;;  %v1263_v47 = vunpack.i.l.bf16 %v1262_v28 }
 0x213   : > { %1110 = vmatpush1.bf16.msra.mxu1 %v1109_v32  ;;  %v767_v35 = vsel %vm763_vm14, %v1253_v31, %v1254_v30  ;;  %v766_v36 = vsel %vm763_vm14, %v1239_v29, %v1253_v31  ;;  %v813_v62 = vsel %vm811_vm0, %v1263_v47, %v1264_v45 }
 0x214   : > { %v1257_v39 = vpop.permute.xlu0 %1256  ;;  %v1272_v40 = vpop.permute.xlu1 %1271  ;;  %v1111_v41 = vpack.c.bf16 %v767_v35, %v765_v33  ;;  %v1113_v42 = vpack.c.bf16 %v766_v36, %v764_v34 }
 0x215   : > { %v1259_v43 = vunpack.i.h.bf16 %v1257_v39  ;;  %v1258_v44 = vunpack.i.l.bf16 %v1257_v39  ;;  %v1273_v48 = vunpack.i.l.bf16 %v1272_v40  ;;  %v1274_v59 = vunpack.i.h.bf16 %v1272_v40 }
 0x216   : > { %1112 = vmatprep.subr.bf16.mxu1 %v1111_v41 }
 0x217   : > { %1114 = vmatpush1.bf16.msra.mxu1 %v1113_v42  ;;  %v785_v49 = vsel %vm784_vm15, %v1258_v44, %v1243_v24  ;;  %v787_v50 = vsel %vm784_vm15, %v1259_v43, %v1248_v26  ;;  %v812_v0 = vsel %vm811_vm0, %v1273_v48, %v1263_v47 }
 0x218   : > { %v1267_v51 = vpop.permute.xlu0 %1266  ;;  %1116 = vmatprep.subr.bf16.mxu1 %v1115_v46  ;;  %v1117_v57 = vpack.c.bf16 %v787_v50, %v785_v49 }
 0x219   : > { %v1269_v60 = vunpack.i.h.bf16 %v1267_v51  ;;  %v1268_v61 = vunpack.i.l.bf16 %v1267_v51 }
 0x21b   : > { %1118 = vmatpush1.bf16.msra.mxu1 %v1117_v57  ;;  %v815_v63 = vsel %vm811_vm0, %v1268_v61, %v1269_v60  ;;  %v814_v1 = vsel %vm811_vm0, %v1274_v59, %v1268_v61 }
 0x21c   : > { %v1119_v2 = vpack.c.bf16 %v815_v63, %v813_v62  ;;  %v1121_v52 = vpack.c.bf16 %v814_v1, %v812_v0 }
 0x21e   : > { %1120 = vmatprep.subr.bf16.mxu1 %v1119_v2 }
 0x21f   : > { %1122 = vmatpush1.bf16.msra.mxu1 %v1121_v52 }
 0x222   : > { %896 = vmatmul.mubr.f32.vlgmr.msra.gmra.mrb[0].mxu1 %v820_v53 }
 0x225   : > { %v909_v4 = vpop.permute.xlu1 %908 }
 0x229   : > { %v826_v56 = vpop.permute.xlu0 %825 }
 0x25b   : > { %v981_v54 = vpop.f32.mrb[4].mxu0 }
 0x25c   : > { %v983_v55 = vpop.f32.mrb[5].mxu0 }
 0x2f5   : > { %v897_v3 = vpop.f32.mrb[0].mxu1 }
 0x2f6   : > { %v898_v58 = vadd.f32 %v897_v3, %v826_v56  ;;  %v899_v5 = vpop.f32.mrb[1].mxu1 }
 0x2f7   : > { %v900_v6 = vadd.f32 %v899_v5, %v826_v56 }
 0x2f8   : > { %v1124_v7 = vadd.f32 %v909_v4, %v898_v58 }
 0x2f9   : > { %v1127_v8 = vadd.f32 %v909_v4, %v900_v6 }
 0x2fa   : > { %v1125_v9 = vadd.f32 %v1124_v7, %v981_v54 }
 0x2fb   : > { %v1128_v11 = vadd.f32 %v1127_v8, %v983_v55 }
 0x2fc   : > { %v988_v12 = vmax.f32 %v1125_v9, 0.0 }
 0x2fd   : > { %v989_v13 = vmax.f32 %v1128_v11, 0.0 }
 0x2fe   : > { %990 = vst [vmem:[%s352_s17] sm:$0xff] %v988_v12 }
 0x2ff   : > { %991 = vst [vmem:[%s352_s17 + $0x8] sm:$0xff] %v989_v13 }
 0x300 PF: > { %s19_s30 = sadd.s32 1, %s1282_s30  }
 0x301   : > { %p16_p4 = scmp.ge.s32.totalorder %s19_s30, 4  }
 0x303   :  { %18 = sbr.rel (!%p16_p4) target bundleno = 1 (0x1), region = 89 }

</bundles_post_ra>
